<compile_context>
chip_gen: v5e
topology: v5e:2x2
jax: 0.10.0
libtpu: 0.0.40
codegen_flags: <defaults>
</compile_context>

<pallas_src>
import functools

import jax
import jax.numpy as jnp
from jax.experimental import pallas as pl
from jax.experimental.pallas import tpu as pltpu


def _leaky_relu(v, slope=0.01):
    return jnp.where(v > 0, v, slope * v)


def _round_up(n, m):
    return ((n + m - 1) // m) * m


def _cdiv(a, b):
    return (a + b - 1) // b


def mlp_kernel(x_ref, w1_ref, b1_ref, w2_ref, b2_ref, w3_ref, b3_ref,
               w4_ref, b4_ref, o_ref):
    # Whole MLP in one fused pass.  Weight blocks are grid-invariant (index_map -> 0),
    # so they stay resident in VMEM across all batch tiles.
    x = x_ref[...].astype(jnp.bfloat16)                       # cast in-kernel; x DMA'd f32

    h = jnp.dot(x, w1_ref[...], preferred_element_type=jnp.float32) + b1_ref[...]
    h = _leaky_relu(h).astype(jnp.bfloat16)                   # (bb, 256)
    # TODO(synk): nn.Dropout(0.3) is identity at inference; training-mode RNG mask not emitted.

    h = jnp.dot(h, w2_ref[...], preferred_element_type=jnp.float32) + b2_ref[...]
    h = _leaky_relu(h).astype(jnp.bfloat16)                   # (bb, 128)

    h = jnp.dot(h, w3_ref[...], preferred_element_type=jnp.float32) + b3_ref[...]
    h = _leaky_relu(h).astype(jnp.bfloat16)                   # (bb, 128); cols 64.. are 0

    # fc4 with batch on the lane axis: (8,128) . (bb,128)^T -> (8, bb) f32.
    # Row 0 of w4t is the real fc4 column (padded 64->128), rows 1..7 are zeros.
    out8 = jax.lax.dot_general(
        w4_ref[...], h,
        dimension_numbers=(((1,), (1,)), ((), ())),
        preferred_element_type=jnp.float32)
    out = out8[0:1, :] + b4_ref[...]                          # (1, bb) lane-dense batch
    o_ref[...] = out[None].astype(o_ref.dtype)                # (1, 1, bb) store


def prepare_params(params):
    """One-time weight preparation (hoisted out of the per-call path)."""
    w1, b1, w2, b2, w3, b3, w4, b4 = params
    w1b = w1.astype(jnp.bfloat16)                                               # (D, 256)
    w2b = w2.astype(jnp.bfloat16)                                               # (256,128)
    w3p = jnp.pad(w3, ((0, 0), (0, 128 - w3.shape[1]))).astype(jnp.bfloat16)    # (128,128)
    b3p = jnp.pad(b3, ((0, 0), (0, 128 - b3.shape[1])))                         # (1, 128)
    # fc4 transposed: (64,1) -> (1,64) -> pad to (8,128); row 0 real, rest zero.
    w4t = jnp.pad(w4.T, ((0, 8 - w4.shape[1]),
                         (0, 128 - w4.shape[0]))).astype(jnp.bfloat16)          # (8, 128)
    return (w1b, b1, w2b, b2, w3p, b3p, w4t, b4)


@functools.partial(jax.jit, static_argnames=("block_b",))
def mlp_forward(x, prepared_params, block_b=None):
    """x: (B, input_dim) f32 -> (B, 1) f32.  prepared_params from prepare_params()."""
    w1b, b1, w2b, b2, w3p, b3p, w4t, b4 = prepared_params
    B, D = x.shape

    if block_b is None:
        # grid >= 2 whenever B > 128 (both v7x TensorCores get work); multiples of 128
        # keep the lane-dense output stores unmasked; 2048 cap amortizes the ~0.35us/step
        # pipeline overhead while the double-buffered working set stays a few MiB (<< VMEM).
        block_b = max(128, min(2048, _round_up(_cdiv(B, 2), 128)))

    nb = _cdiv(B, block_b)   # ragged last block: Pallas clips the input DMA; garbage rows
                             # only feed output lanes that are sliced off below.

    x_map = lambda i: (i, 0)
    w_map = lambda i: (0, 0)

    in_specs = [
        pl.BlockSpec((block_b, D), x_map),     # x tile, f32 (cast to bf16 in-kernel)
        pl.BlockSpec(w1b.shape, w_map),        # W1 (D, 256)        bf16, resident
        pl.BlockSpec(b1.shape, w_map),         # b1 (1, 256)        f32
        pl.BlockSpec(w2b.shape, w_map),        # W2 (256, 128)      bf16
        pl.BlockSpec(b2.shape, w_map),         # b2 (1, 128)        f32
        pl.BlockSpec(w3p.shape, w_map),        # W3 (128, 128) pad  bf16
        pl.BlockSpec(b3p.shape, w_map),        # b3 (1, 128) pad    f32
        pl.BlockSpec(w4t.shape, w_map),        # W4^T (8, 128) pad  bf16
        pl.BlockSpec(b4.shape, w_map),         # b4 (1, 1)          f32
    ]
    out_spec = pl.BlockSpec((1, 1, block_b), lambda i: (i, 0, 0))

    flops = 2 * nb * block_b * (D * 256 + 256 * 128 + 128 * 128 + 128 * 8)
    bytes_accessed = (
        x.size * 4 + nb * block_b * 4
        + (w1b.size + w2b.size + w3p.size + w4t.size) * 2
        + (b1.size + b2.size + b3p.size + b4.size) * 4)

    out = pl.pallas_call(
        mlp_kernel,
        out_shape=jax.ShapeDtypeStruct((nb, 1, block_b), jnp.float32),
        grid_spec=pl.GridSpec(grid=(nb,), in_specs=in_specs, out_specs=out_spec),
        compiler_params=pltpu.CompilerParams(dimension_semantics=("parallel",)),
        cost_estimate=pl.CostEstimate(flops=flops, transcendentals=0,
                                      bytes_accessed=bytes_accessed),
    )(x, w1b, b1, w2b, b2, w3p, b3p, w4t, b4)

    # block i, lane j  <->  batch row i*block_b + j  (row-major), so a flat reshape
    # restores batch order; rows >= B are discarded.
    return out.reshape(nb * block_b, 1)[:B]


def init_params(key, input_dim):
    """Deterministic init; shapes match MLPModel.__init__ (weights stored (in, out))."""
    dims = [(input_dim, 256), (256, 128), (128, 64), (64, 1)]
    params = []
    for fin, fout in dims:
        kw, kb, key = jax.random.split(key, 3)
        bound = 1.0 / jnp.sqrt(fin)
        w = jax.random.uniform(kw, (fin, fout), jnp.float32, -bound, bound)
        b = jax.random.uniform(kb, (1, fout), jnp.float32, -bound, bound)
        params += [w, b]
    return tuple(params)


def mlp_reference(x, params):
    w1, b1, w2, b2, w3, b3, w4, b4 = params
    h = jax.nn.leaky_relu(x @ w1 + b1, 0.01)
    h = jax.nn.leaky_relu(h @ w2 + b2, 0.01)
    h = jax.nn.leaky_relu(h @ w3 + b3, 0.01)
    return h @ w4 + b4


if __name__ == "__main__":
    key = jax.random.PRNGKey(0)
    kx, kp = jax.random.split(key)

    input_dim = 32
    params = init_params(kp, input_dim)
    prepped = prepare_params(params)   # one-time weight prep (not in the per-call path)

    # Case 1: tiny batch, single (partial) tile.
    x_small = jax.random.normal(kx, (8, input_dim), jnp.float32)
    out_small = jax.block_until_ready(mlp_forward(x_small, prepped))
    ref_small = mlp_reference(x_small, params)
    assert out_small.shape == (8, 1)
    assert jnp.allclose(out_small, ref_small, atol=5e-2, rtol=5e-2), \
        "mismatch vs reference (small batch)"

    # Case 2: non-multiple batch, multi-step grid with a ragged last block (block_b=128).
    kx2, _ = jax.random.split(kx)
    x_big = jax.random.normal(kx2, (300, input_dim), jnp.float32)
    out_big = jax.block_until_ready(mlp_forward(x_big, prepped, block_b=128))
    ref_big = mlp_reference(x_big, params)
    assert out_big.shape == (300, 1)
    assert jnp.allclose(out_big, ref_big, atol=5e-2, rtol=5e-2), \
        "mismatch vs reference (ragged batch, block_b=128)"

    # Case 3: default block_b path (grid of 2 -> both TensorCores on v7x).
    out_def = jax.block_until_ready(mlp_forward(x_big, prepped))
    assert jnp.allclose(out_def, ref_big, atol=5e-2, rtol=5e-2), \
        "mismatch vs reference (default block_b)"

    print("KERNEL_OK")
</pallas_src>

<mosaic_0001>
module attributes {stable_mosaic.version = 11 : i64} {
  func.func @mlp_kernel(%arg0: i32, %arg1: memref<128x32xf32, #tpu.memory_space<vmem>>, %arg2: memref<32x256xbf16, #tpu.memory_space<vmem>>, %arg3: memref<1x256xf32, #tpu.memory_space<vmem>>, %arg4: memref<256x128xbf16, #tpu.memory_space<vmem>>, %arg5: memref<1x128xf32, #tpu.memory_space<vmem>>, %arg6: memref<128x128xbf16, #tpu.memory_space<vmem>>, %arg7: memref<1x128xf32, #tpu.memory_space<vmem>>, %arg8: memref<8x128xbf16, #tpu.memory_space<vmem>>, %arg9: memref<1x1xf32, #tpu.memory_space<vmem>>, %arg10: memref<1x1x128xf32, #tpu.memory_space<vmem>>) attributes {dimension_semantics = [#tpu.dimension_semantics<parallel>], iteration_bounds = array<i64: 1>, scalar_prefetch = 0 : i64, scratch_operands = 0 : i64, tpu.core_type = #tpu.core_type<tc>, window_params = [{transform_indices = @transform_0, window_bounds = array<i64: 128, 32>}, {pipeline_mode = #tpu.pipeline_mode<synchronous>, transform_indices = @transform_1, window_bounds = array<i64: 32, 256>}, {pipeline_mode = #tpu.pipeline_mode<synchronous>, transform_indices = @transform_2, window_bounds = array<i64: 1, 256>}, {pipeline_mode = #tpu.pipeline_mode<synchronous>, transform_indices = @transform_3, window_bounds = array<i64: 256, 128>}, {pipeline_mode = #tpu.pipeline_mode<synchronous>, transform_indices = @transform_4, window_bounds = array<i64: 1, 128>}, {pipeline_mode = #tpu.pipeline_mode<synchronous>, transform_indices = @transform_5, window_bounds = array<i64: 128, 128>}, {pipeline_mode = #tpu.pipeline_mode<synchronous>, transform_indices = @transform_6, window_bounds = array<i64: 1, 128>}, {pipeline_mode = #tpu.pipeline_mode<synchronous>, transform_indices = @transform_7, window_bounds = array<i64: 8, 128>}, {pipeline_mode = #tpu.pipeline_mode<synchronous>, transform_indices = @transform_8, window_bounds = array<i64: 1, 1>}, {transform_indices = @transform_9, window_bounds = array<i64: 1, 1, 128>}]} {
    %c0 = arith.constant 0 : index
    %c0_0 = arith.constant 0 : index
    %0 = vector.load %arg1[%c0, %c0_0] : memref<128x32xf32, #tpu.memory_space<vmem>>, vector<128x32xf32>
    %1 = arith.truncf %0 : vector<128x32xf32> to vector<128x32xbf16>
    %c0_1 = arith.constant 0 : index
    %c0_2 = arith.constant 0 : index
    %2 = vector.load %arg2[%c0_1, %c0_2] : memref<32x256xbf16, #tpu.memory_space<vmem>>, vector<32x256xbf16>
    %cst = arith.constant dense<0.000000e+00> : vector<128x256xf32>
    %3 = tpu.matmul %1, %2, %cst {dimension_numbers = #tpu.dot_dimension_numbers<[1], [0], [0], [1], [0, 0, 1, 1], [], []>} : vector<128x32xbf16>, vector<32x256xbf16>, vector<128x256xf32> -> vector<128x256xf32>
    %c0_3 = arith.constant 0 : index
    %c0_4 = arith.constant 0 : index
    %4 = vector.load %arg3[%c0_3, %c0_4] : memref<1x256xf32, #tpu.memory_space<vmem>>, vector<1x256xf32>
    %5 = vector.broadcast %4 : vector<1x256xf32> to vector<128x256xf32>
    %6 = arith.addf %3, %5 : vector<128x256xf32>
    %cst_5 = arith.constant 0.000000e+00 : f32
    %7 = vector.broadcast %cst_5 : f32 to vector<128x256xf32>
    %8 = arith.cmpf ogt, %6, %7 : vector<128x256xf32>
    %cst_6 = arith.constant 0.00999999977 : f32
    %9 = vector.broadcast %cst_6 : f32 to vector<128x256xf32>
    %10 = arith.mulf %9, %6 : vector<128x256xf32>
    %11 = arith.select %8, %6, %10 : vector<128x256xi1>, vector<128x256xf32>
    %12 = arith.truncf %11 : vector<128x256xf32> to vector<128x256xbf16>
    %c0_7 = arith.constant 0 : index
    %c0_8 = arith.constant 0 : index
    %13 = vector.load %arg4[%c0_7, %c0_8] : memref<256x128xbf16, #tpu.memory_space<vmem>>, vector<256x128xbf16>
    %cst_9 = arith.constant dense<0.000000e+00> : vector<128x128xf32>
    %14 = tpu.matmul %12, %13, %cst_9 {dimension_numbers = #tpu.dot_dimension_numbers<[1], [0], [0], [1], [0, 0, 1, 1], [], []>} : vector<128x256xbf16>, vector<256x128xbf16>, vector<128x128xf32> -> vector<128x128xf32>
    %c0_10 = arith.constant 0 : index
    %c0_11 = arith.constant 0 : index
    %15 = vector.load %arg5[%c0_10, %c0_11] : memref<1x128xf32, #tpu.memory_space<vmem>>, vector<1x128xf32>
    %16 = vector.broadcast %15 : vector<1x128xf32> to vector<128x128xf32>
    %17 = arith.addf %14, %16 : vector<128x128xf32>
    %cst_12 = arith.constant 0.000000e+00 : f32
    %18 = vector.broadcast %cst_12 : f32 to vector<128x128xf32>
    %19 = arith.cmpf ogt, %17, %18 : vector<128x128xf32>
    %cst_13 = arith.constant 0.00999999977 : f32
    %20 = vector.broadcast %cst_13 : f32 to vector<128x128xf32>
    %21 = arith.mulf %20, %17 : vector<128x128xf32>
    %22 = arith.select %19, %17, %21 : vector<128x128xi1>, vector<128x128xf32>
    %23 = arith.truncf %22 : vector<128x128xf32> to vector<128x128xbf16>
    %c0_14 = arith.constant 0 : index
    %c0_15 = arith.constant 0 : index
    %24 = vector.load %arg6[%c0_14, %c0_15] : memref<128x128xbf16, #tpu.memory_space<vmem>>, vector<128x128xbf16>
    %cst_16 = arith.constant dense<0.000000e+00> : vector<128x128xf32>
    %25 = tpu.matmul %23, %24, %cst_16 {dimension_numbers = #tpu.dot_dimension_numbers<[1], [0], [0], [1], [0, 0, 1, 1], [], []>} : vector<128x128xbf16>, vector<128x128xbf16>, vector<128x128xf32> -> vector<128x128xf32>
    %c0_17 = arith.constant 0 : index
    %c0_18 = arith.constant 0 : index
    %26 = vector.load %arg7[%c0_17, %c0_18] : memref<1x128xf32, #tpu.memory_space<vmem>>, vector<1x128xf32>
    %27 = vector.broadcast %26 : vector<1x128xf32> to vector<128x128xf32>
    %28 = arith.addf %25, %27 : vector<128x128xf32>
    %cst_19 = arith.constant 0.000000e+00 : f32
    %29 = vector.broadcast %cst_19 : f32 to vector<128x128xf32>
    %30 = arith.cmpf ogt, %28, %29 : vector<128x128xf32>
    %cst_20 = arith.constant 0.00999999977 : f32
    %31 = vector.broadcast %cst_20 : f32 to vector<128x128xf32>
    %32 = arith.mulf %31, %28 : vector<128x128xf32>
    %33 = arith.select %30, %28, %32 : vector<128x128xi1>, vector<128x128xf32>
    %34 = arith.truncf %33 : vector<128x128xf32> to vector<128x128xbf16>
    %c0_21 = arith.constant 0 : index
    %c0_22 = arith.constant 0 : index
    %35 = vector.load %arg8[%c0_21, %c0_22] : memref<8x128xbf16, #tpu.memory_space<vmem>>, vector<8x128xbf16>
    %cst_23 = arith.constant dense<0.000000e+00> : vector<8x128xf32>
    %36 = tpu.matmul %35, %34, %cst_23 {dimension_numbers = #tpu.dot_dimension_numbers<[1], [1], [0], [0], [0, 0, 1, 0], [], []>} : vector<8x128xbf16>, vector<128x128xbf16>, vector<8x128xf32> -> vector<8x128xf32>
    %37 = vector.extract_strided_slice %36 {offsets = [0, 0], sizes = [1, 128], strides = [1, 1]} : vector<8x128xf32> to vector<1x128xf32>
    %c0_24 = arith.constant 0 : index
    %c0_25 = arith.constant 0 : index
    %38 = vector.load %arg9[%c0_24, %c0_25] : memref<1x1xf32, #tpu.memory_space<vmem>>, vector<1x1xf32>
    %39 = vector.broadcast %38 : vector<1x1xf32> to vector<1x128xf32>
    %40 = arith.addf %37, %39 : vector<1x128xf32>
    %41 = vector.shape_cast %40 : vector<1x128xf32> to vector<1x1x128xf32>
    %c0_26 = arith.constant 0 : index
    %c0_27 = arith.constant 0 : index
    %c0_28 = arith.constant 0 : index
    %42 = vector.load %arg10[%c0_26, %c0_27, %c0_28] : memref<1x1x128xf32, #tpu.memory_space<vmem>>, vector<1x1x128xf32>
    tpu.vector_store %arg10[%c0_26, %c0_27, %c0_28], %41 {strides = array<i32>} : memref<1x1x128xf32, #tpu.memory_space<vmem>>, vector<1x1x128xf32>,
    return
  }
  func.func @transform_0(%arg0: i32) -> (i32, i32) {
    %c0_i32 = arith.constant 0 : i32
    %c0_i32_0 = arith.constant 0 : i32
    return %arg0, %c0_i32 : i32, i32
  }
  func.func @transform_1(%arg0: i32) -> (i32, i32) {
    %c0_i32 = arith.constant 0 : i32
    %c0_i32_0 = arith.constant 0 : i32
    %c0_i32_1 = arith.constant 0 : i32
    return %c0_i32, %c0_i32_0 : i32, i32
  }
  func.func @transform_2(%arg0: i32) -> (i32, i32) {
    %c0_i32 = arith.constant 0 : i32
    %c0_i32_0 = arith.constant 0 : i32
    %c0_i32_1 = arith.constant 0 : i32
    return %c0_i32, %c0_i32_0 : i32, i32
  }
  func.func @transform_3(%arg0: i32) -> (i32, i32) {
    %c0_i32 = arith.constant 0 : i32
    %c0_i32_0 = arith.constant 0 : i32
    %c0_i32_1 = arith.constant 0 : i32
    return %c0_i32, %c0_i32_0 : i32, i32
  }
  func.func @transform_4(%arg0: i32) -> (i32, i32) {
    %c0_i32 = arith.constant 0 : i32
    %c0_i32_0 = arith.constant 0 : i32
    %c0_i32_1 = arith.constant 0 : i32
    return %c0_i32, %c0_i32_0 : i32, i32
  }
  func.func @transform_5(%arg0: i32) -> (i32, i32) {
    %c0_i32 = arith.constant 0 : i32
    %c0_i32_0 = arith.constant 0 : i32
    %c0_i32_1 = arith.constant 0 : i32
    return %c0_i32, %c0_i32_0 : i32, i32
  }
  func.func @transform_6(%arg0: i32) -> (i32, i32) {
    %c0_i32 = arith.constant 0 : i32
    %c0_i32_0 = arith.constant 0 : i32
    %c0_i32_1 = arith.constant 0 : i32
    return %c0_i32, %c0_i32_0 : i32, i32
  }
  func.func @transform_7(%arg0: i32) -> (i32, i32) {
    %c0_i32 = arith.constant 0 : i32
    %c0_i32_0 = arith.constant 0 : i32
    %c0_i32_1 = arith.constant 0 : i32
    return %c0_i32, %c0_i32_0 : i32, i32
  }
  func.func @transform_8(%arg0: i32) -> (i32, i32) {
    %c0_i32 = arith.constant 0 : i32
    %c0_i32_0 = arith.constant 0 : i32
    %c0_i32_1 = arith.constant 0 : i32
    return %c0_i32, %c0_i32_0 : i32, i32
  }
  func.func @transform_9(%arg0: i32) -> (i32, i32, i32) {
    %c0_i32 = arith.constant 0 : i32
    %c0_i32_0 = arith.constant 0 : i32
    %c0_i32_1 = arith.constant 0 : i32
    return %arg0, %c0_i32, %c0_i32_0 : i32, i32, i32
  }
}

</mosaic_0001>

<bundles_post_ra>
// kernel: mlp_forward.1
= control target key start
LH: loop header
LB: loop body
LE: loop exit
PB: predicated region body
PF: predicated region fallthrough
CT: control target
= control target key end

     0   :  { %s1395_s0 = inlined_call_operand.hbm [shape: f32[8,32], index: 0, kind: input, shape index: {}]   ;;  %s1396_s1 = inlined_call_operand.hbm [shape: bf16[32,256], index: 1, kind: input, shape index: {}]   ;;  %s1397_s2 = inlined_call_operand.vmem [shape: f32[1,256], index: 2, kind: input, shape index: {}]   ;;  %s1398_s3 = inlined_call_operand.hbm [shape: bf16[256,128], index: 3, kind: input, shape index: {}]   ;;  %s1399_s4 = inlined_call_operand.vmem [shape: f32[1,128], index: 4, kind: input, shape index: {}]   ;;  %s1400_s5 = inlined_call_operand.hbm [shape: bf16[128,128], index: 5, kind: input, shape index: {}]   ;;  %s1401_s6 = inlined_call_operand.hbm [shape: f32[1,128], index: 6, kind: input, shape index: {}]   ;;  %s1402_s7 = inlined_call_operand.vmem [shape: bf16[8,128], index: 7, kind: input, shape index: {}]   ;;  %s1403_s8 = inlined_call_operand.<no memory space> [shape: f32[1,1], index: 8, kind: input, shape index: {}]   ;;  %s1404_s9 = inlined_call_operand.vmem [shape: f32[1,1,128], index: 9, kind: output, shape index: {}]  }
   0x1   :  { %v14_v0 = vstv %s1403_s8 }
   0x2   :  { %15 = vst [vmem:[#allocation2] sm:$0x1] %v14_v0 }
   0x3   :  { %16 = vsyncpa [#allocation4], 0 }
   0x4   :  { %17 = vsyncpa [#allocation6], 0 }
   0x5   :  { %18 = vsyncpa [#allocation9], 0 }
   0x6   :  { %22 = vsyncadd [#allocation4], 1920  ;;  %s36_s13 = sshll.u32 %s1396_s1, 4  ;;  %s1190_s14 = smov [#allocation5]   ;;  %s37_s13 = int_to_ptr.hbm [resolvable:$true] %s36_s13 }
   0x7   :  { %s38_s15 = sshll.u32 %s1190_s14, 4  ;;  %s1191_s16 = smov 128   ;;  %s39_s15 = int_to_ptr.vmem [resolvable:$true] %s38_s15 }
   0x8   :  { %s1192_s17 = smov 8   ;;  %s66_s8 = sshll.u32 %s1400_s5, 4  ;;  %s67_s8 = int_to_ptr.hbm [resolvable:$true] %s66_s8 }
   0x9   :  { %44 = dma.hbm_to_vmem [thread:$0]  %s37_s13, 512, %s39_s15, [#allocation6], %s1191_s16, %s1191_s16, %s1192_s17  }
   0xa   :  { %s1193_s20 = smov [#allocation8]   ;;  %s23_s24 = sshll.u32 %s1395_s0, 4  ;;  %s24_s24 = int_to_ptr.hbm [resolvable:$true] %s23_s24 }
   0xb   :  { %s68_s21 = sshll.u32 %s1193_s20, 4  ;;  %s1194_s1 = smov 64   ;;  %s69_s21 = int_to_ptr.vmem [resolvable:$true] %s68_s21 }
   0xc   :  { %s1195_s25 = smov 4   ;;  %s51_s28 = sshll.u32 %s1398_s3, 4  ;;  %s52_s28 = int_to_ptr.hbm [resolvable:$true] %s51_s28 }
   0xd   :  { %74 = dma.hbm_to_vmem [thread:$0]  %s67_s8, 1024, %s69_s21, [#allocation9], %s1194_s1, %s1194_s1, %s1195_s25  }
   0xe   :  { %s1196_s29 = smov [#allocation3]   ;;  %s1197_s5 = smov [#allocation7]  }
   0xf   :  { %s25_s30 = sshll.u32 %s1196_s29, 4  ;;  %s53_s10 = sshll.u32 %s1197_s5, 4  ;;  %s26_s30 = int_to_ptr.vmem [resolvable:$true] %s25_s30  ;;  %s54_s10 = int_to_ptr.vmem [resolvable:$true] %s53_s10 }
  0x10   :  { %31 = dma.hbm_to_vmem [thread:$0]  %s24_s24, 128, %s26_s30, [#allocation4], %s1191_s16, %s1191_s16, %s1192_s17  }
  0x11   :  { %s80_s0 = sshll.u32 %s1401_s6, 4  ;;  %s1198_s13 = smov [#allocation10]   ;;  %s81_s0 = int_to_ptr.hbm [resolvable:$true] %s80_s0 }
  0x12   :  { %59 = dma.hbm_to_vmem [thread:$0]  %s52_s28, 2048, %s54_s10, [#allocation6], %s1194_s1, %s1194_s1, %s1195_s25  }
  0x13   :  { %s82_s14 = sshll.u32 %s1198_s13, 4  ;;  %s83_s14 = int_to_ptr.vmem [resolvable:$true] %s82_s14 }
  0x14   :  { %85 = dma.hbm_to_vmem [thread:$0]  %s81_s0, 16, %s83_s14, [#allocation9]  }
  0x15   :  { %1184 = dma.done.wait [#allocation4], 2048  }
  0x16   :  { %1185 = vsyncadd [#allocation4], 4294965248 }
  0x17   :  { %1186 = dma.done.wait [#allocation6], 2560  }
  0x18   :  { %1187 = vsyncadd [#allocation6], 4294964736 }
  0x19   :  { %1188 = dma.done.wait [#allocation9], 1040  }
  0x1a   :  { %1189 = vsyncadd [#allocation9], 4294966256  ;;  %v899_v1 = vld [vmem:[#allocation5 + $0x10] sm:$0xf]  ;;  %v1020_v2 = vld [vmem:[#allocation5 + $0x14] sm:$0xf0] }
  0x1b   :  { %v891_v3 = vld [vmem:[#allocation5] sm:$0xf]  ;;  %v900_v4 = vor.u32 %v1020_v2, %v899_v1  ;;  %v1018_v5 = vld [vmem:[#allocation5 + $0x4] sm:$0xf0]  ;;  %v1019_v11 = vld [vmem:[#allocation5 + $0x14] sm:$0xf] }
  0x1c   :  { %v111_v6 = vld [vmem:[#allocation3] sm:$0xff]  ;;  %v892_v7 = vor.u32 %v1018_v5, %v891_v3  ;;  %v112_v8 = vld [vmem:[#allocation3 + $0x8] sm:$0xff]  ;;  %v901_v12 = vld [vmem:[#allocation5 + $0x18] sm:$0xf0]  ;;  %vm165_vm0 = vcmask 261120  }
  0x1d   :  { %196 = vmatpush.bf16.msra.mxu0 %v900_v4  ;;  %1045 = vmatpush.bf16.msra.mxu1 %v900_v4  ;;  %v115_v9 = vld [vmem:[#allocation3 + $0x20] sm:$0xff]  ;;  %v116_v10 = vld [vmem:[#allocation3 + $0x28] sm:$0xff]  ;;  %v904_v14 = vor.u32 %v1019_v11, %v901_v12  ;;  %v127_v16 = vpack.c.bf16 %v112_v8, %v111_v6  ;;  %v113_v19 = vld [vmem:[#allocation3 + $0x10] sm:$0xff] }
  0x1e   :  { %v1017_v13 = vld [vmem:[#allocation5 + $0x4] sm:$0xf]  ;;  %1046 = vmatpush.bf16.msra.mxu2 %v900_v4  ;;  %1047 = vmatpush.bf16.msra.mxu3 %v900_v4  ;;  %v893_v15 = vld [vmem:[#allocation5 + $0x8] sm:$0xf0]  ;;  %v129_v17 = vpack.c.bf16 %v116_v10, %v115_v9  ;;  %v114_v20 = vld [vmem:[#allocation3 + $0x18] sm:$0xff] }
  0x1f   :  { %v896_v18 = vor.u32 %v1017_v13, %v893_v15  ;;  %v117_v21 = vld [vmem:[#allocation3 + $0x30] sm:$0xff]  ;;  %v118_v22 = vld [vmem:[#allocation3 + $0x38] sm:$0xff]  ;;  %v128_v23 = vpack.c.bf16 %v114_v20, %v113_v19  ;;  %v119_v25 = vld [vmem:[#allocation3 + $0x40] sm:$0xff] }
  0x20   :  { %v130_v24 = vpack.c.bf16 %v118_v22, %v117_v21  ;;  %v120_v26 = vld [vmem:[#allocation3 + $0x48] sm:$0xff]  ;;  %v121_v28 = vld [vmem:[#allocation3 + $0x50] sm:$0xff]  ;;  %v122_v29 = vld [vmem:[#allocation3 + $0x58] sm:$0xff] }
  0x21   :  { %197 = vmatpush.bf16.msra.mxu0 %v892_v7  ;;  %1048 = vmatpush.bf16.msra.mxu1 %v892_v7  ;;  %v131_v27 = vpack.c.bf16 %v120_v26, %v119_v25  ;;  %v132_v30 = vpack.c.bf16 %v122_v29, %v121_v28  ;;  %v123_v31 = vld [vmem:[#allocation3 + $0x60] sm:$0xff]  ;;  %v124_v32 = vld [vmem:[#allocation3 + $0x68] sm:$0xff]  ;;  %v1028_v33 = vld [vmem:[#allocation7 + $0x38] sm:$0xff] }
  0x22   :  { %1049 = vmatpush.bf16.msra.mxu2 %v892_v7  ;;  %1050 = vmatpush.bf16.msra.mxu3 %v892_v7  ;;  %v133_v34 = vpack.c.bf16 %v124_v32, %v123_v31  ;;  %v1027_v35 = vld [vmem:[#allocation7 + $0x30] sm:$0xff]  ;;  %v126_v37 = vld [vmem:[#allocation3 + $0x78] sm:$0xff]  ;;  %v1026_v39 = vld [vmem:[#allocation7 + $0x28] sm:$0xff] }
  0x23   :  { %v125_v36 = vld [vmem:[#allocation3 + $0x70] sm:$0xff]  ;;  %v1025_v40 = vld [vmem:[#allocation7 + $0x20] sm:$0xff]  ;;  %v1024_v41 = vld [vmem:[#allocation7 + $0x18] sm:$0xff] }
  0x24   :  { %905 = vmatmul.msk.bf16.vlgmr.msra.gmra.mxu0 %vm165_vm0, %v127_v16  ;;  %907 = vmatmul.msk.bf16.vlgmr.msra.gmra.mxu1 %vm165_vm0, %v129_v17  ;;  %v134_v38 = vpack.c.bf16 %v126_v37, %v125_v36  ;;  %v1023_v42 = vld [vmem:[#allocation7 + $0x10] sm:$0xff]  ;;  %v1022_v43 = vld [vmem:[#allocation7 + $0x8] sm:$0xff]  ;;  %v1021_v44 = vld [vmem:[#allocation7] sm:$0xff] }
  0x25   :  { %245 = vmatpush.bf16.msrb.mxu1 %v904_v14  ;;  %909 = vmatmul.msk.bf16.vlgmr.msra.gmra.mxu2 %vm165_vm0, %v131_v27  ;;  %v1036_v45 = vld [vmem:[#allocation7 + $0x78] sm:$0xff]  ;;  %v1035_v46 = vld [vmem:[#allocation7 + $0x70] sm:$0xff]  ;;  %v1034_v47 = vld [vmem:[#allocation7 + $0x68] sm:$0xff] }
  0x26   :  { %532 = vmatpush.bf16.msrb.mxu2 %v1028_v33  ;;  %912 = vmatmul.msk.bf16.vlgmr.msra.gmra.mxu3 %vm165_vm0, %v134_v38  ;;  %v1033_v48 = vld [vmem:[#allocation7 + $0x60] sm:$0xff]  ;;  %v1032_v50 = vld [vmem:[#allocation7 + $0x58] sm:$0xff]  ;;  %v1031_v55 = vld [vmem:[#allocation7 + $0x50] sm:$0xff] }
  0x27   :  { %581 = vmatpush.bf16.msrb.mxu3 %v1036_v45  ;;  %v139_v49 = vld [vmem:[%s1397_s2] sm:$0x3]  ;;  %v1030_v57 = vld [vmem:[#allocation7 + $0x48] sm:$0xff] }
  0x28   :  { %v1285_v53 = vperm.slane %v139_v49, 0  ;;  %v1029_v63 = vld [vmem:[#allocation7 + $0x40] sm:$0xff]  ;;  %v1293_v14 = vperm.slane %v139_v49, 1 }
  0x29   :  { %246 = vmatpush.bf16.msrb.mxu1 %v896_v18 }
  0x2a   :  { %533 = vmatpush.bf16.msrb.mxu2 %v1027_v35 }
  0x2b   :  { %582 = vmatpush.bf16.msrb.mxu3 %v1035_v46 }
  0x2e   :  { %534 = vmatpush.bf16.msrb.mxu2 %v1026_v39 }
  0x2f   :  { %583 = vmatpush.bf16.msrb.mxu3 %v1034_v47 }
  0x32   :  { %535 = vmatpush.bf16.msrb.mxu2 %v1025_v40 }
  0x33   :  { %584 = vmatpush.bf16.msrb.mxu3 %v1033_v48 }
  0x34   :  { %906 = vmatmul.msk.bf16.gmra.mxu0 %vm165_vm0, %v128_v23  ;;  %908 = vmatmul.msk.bf16.gmra.mxu1 %vm165_vm0, %v130_v24 }
  0x35   :  { %910 = vmatmul.msk.bf16.gmra.mxu2 %vm165_vm0, %v132_v30 }
  0x36   :  { %536 = vmatpush.bf16.msrb.mxu2 %v1024_v41 }
  0x37   :  { %585 = vmatpush.bf16.msrb.mxu3 %v1032_v50 }
  0x3a   :  { %537 = vmatpush.bf16.msrb.mxu2 %v1023_v42 }
  0x3b   :  { %586 = vmatpush.bf16.msrb.mxu3 %v1031_v55 }
  0x3e   :  { %538 = vmatpush.bf16.msrb.mxu2 %v1022_v43 }
  0x3f   :  { %587 = vmatpush.bf16.msrb.mxu3 %v1030_v57 }
  0x42   :  { %539 = vmatpush.bf16.msrb.mxu2 %v1021_v44 }
  0x43   :  { %588 = vmatpush.bf16.msrb.mxu3 %v1029_v63 }
  0x44   :  { %913 = vmatmul.msk.bf16.vlgmr.msrb.gmra.mxu1 %vm165_vm0, %v127_v16 }
  0x45   :  { %911 = vmatmul.msk.bf16.gmra.mxu2 %vm165_vm0, %v133_v34 }
  0x54   :  { %914 = vmatmul.msk.bf16.gmra.mxu1 %vm165_vm0, %v128_v23 }
  0x64   :  { %915 = vmatmul.msk.bf16.gmra.mxu1 %vm165_vm0, %v129_v17 }
  0x74   :  { %916 = vmatmul.msk.bf16.gmra.mxu1 %vm165_vm0, %v130_v24 }
  0x84   :  { %917 = vmatmul.msk.bf16.gmra.mxu1 %vm165_vm0, %v131_v27 }
  0x94   :  { %918 = vmatmul.msk.bf16.gmra.mxu1 %vm165_vm0, %v132_v30 }
  0xa1   :  { %v199_v51 = vpop.f32.mrf.mxu0  ;;  %v209_v52 = vpop.f32.mrf.mxu1 }
  0xa2   :  { %v200_v54 = vadd.f32 %v199_v51, %v1285_v53  ;;  %v210_v16 = vadd.f32 %v209_v52, %v1285_v53 }
  0xa4   :  { %919 = vmatmul.msk.bf16.gmra.mxu1 %vm165_vm0, %v133_v34  ;;  %v320_v56 = vmul.f32 0.01, %v200_v54  ;;  %vm288_vm1 = vcmp.gt.f32.partialorder %v200_v54, 0.0  ;;  %v328_v20 = vmul.f32 0.01, %v210_v16  ;;  %vm296_vm7 = vcmp.gt.f32.partialorder %v210_v16, 0.0 }
  0xa6   :  { %v352_v62 = vsel %vm288_vm1, %v200_v54, %v320_v56  ;;  %v360_v26 = vsel %vm296_vm7, %v210_v16, %v328_v20 }
  0xa8   :  { %v219_v25 = vpop.f32.mrf.mxu2 }
  0xa9   :  { %v201_v58 = vpop.f32.mrf.mxu0  ;;  %v211_v59 = vpop.f32.mrf.mxu1  ;;  %v220_v50 = vadd.f32 %v219_v25, %v1285_v53 }
  0xaa   :  { %v202_v60 = vadd.f32 %v201_v58, %v1285_v53  ;;  %v212_v15 = vadd.f32 %v211_v59, %v1285_v53  ;;  %v234_v25 = vpop.f32.mrf.mxu3 }
  0xab   :  { %v336_v54 = vmul.f32 0.01, %v220_v50  ;;  %vm304_vm13 = vcmp.gt.f32.partialorder %v220_v50, 0.0 }
  0xac   :  { %vm290_vm2 = vcmp.gt.f32.partialorder %v202_v60, 0.0  ;;  %v322_v61 = vmul.f32 0.01, %v202_v60  ;;  %v330_v18 = vmul.f32 0.01, %v212_v15  ;;  %vm298_vm5 = vcmp.gt.f32.partialorder %v212_v15, 0.0 }
  0xad   :  { %v368_v59 = vsel %vm304_vm13, %v220_v50, %v336_v54 }
  0xae   :  { %v354_v0 = vsel %vm290_vm2, %v202_v60, %v322_v61  ;;  %v362_v24 = vsel %vm298_vm5, %v212_v15, %v330_v18 }
  0xaf   :  { %v384_v1 = vpack.c.bf16 %v354_v0, %v352_v62  ;;  %v388_v29 = vpack.c.bf16 %v362_v24, %v360_v26 }
  0xb0   :  { %v221_v35 = vpop.f32.mrf.mxu2 }
  0xb1   :  { %v204_v2 = vpop.f32.mrf.mxu0  ;;  %v214_v3 = vpop.f32.mrf.mxu1  ;;  %540 = vmatmul.bf16.vlgmr.msrb.gmra.mxu2 %v384_v1  ;;  %v222_v51 = vadd.f32 %v221_v35, %v1285_v53 }
  0xb2   :  { %v205_v4 = vadd.f32 %v204_v2, %v1285_v53  ;;  %v215_v33 = vadd.f32 %v214_v3, %v1285_v53 }
  0xb3   :  { %v338_v55 = vmul.f32 0.01, %v222_v51  ;;  %vm306_vm14 = vcmp.gt.f32.partialorder %v222_v51, 0.0 }
  0xb4   :  { %920 = vmatmul.msk.bf16.gmra.mxu1 %vm165_vm0, %v134_v38  ;;  %v324_v5 = vmul.f32 0.01, %v205_v4  ;;  %vm292_vm3 = vcmp.gt.f32.partialorder %v205_v4, 0.0  ;;  %v332_v38 = vmul.f32 0.01, %v215_v33  ;;  %vm300_vm10 = vcmp.gt.f32.partialorder %v215_v33, 0.0 }
  0xb5   :  { %v370_v60 = vsel %vm306_vm14, %v222_v51, %v338_v55 }
  0xb6   :  { %v356_v10 = vsel %vm292_vm3, %v205_v4, %v324_v5  ;;  %v364_v43 = vsel %vm300_vm10, %v215_v33, %v332_v38  ;;  %v392_v63 = vpack.c.bf16 %v370_v60, %v368_v59  ;;  %v1043_v59 = vld [vmem:[#allocation8 + $0x30] sm:$0xff] }
  0xb8   :  { %v224_v49 = vpop.f32.mrf.mxu2 }
  0xb9   :  { %v206_v6 = vpop.f32.mrf.mxu0  ;;  %v216_v7 = vpop.f32.mrf.mxu1  ;;  %v225_v4 = vadd.f32 %v224_v49, %v1285_v53 }
  0xba   :  { %v207_v8 = vadd.f32 %v206_v6, %v1285_v53  ;;  %v217_v32 = vadd.f32 %v216_v7, %v1285_v53 }
  0xbb   :  { %vm308_vm1 = vcmp.gt.f32.partialorder %v225_v4, 0.0 }
  0xbc   :  { %v326_v9 = vmul.f32 0.01, %v207_v8  ;;  %vm294_vm4 = vcmp.gt.f32.partialorder %v207_v8, 0.0  ;;  %v334_v36 = vmul.f32 0.01, %v217_v32  ;;  %vm302_vm9 = vcmp.gt.f32.partialorder %v217_v32, 0.0 }
  0xbe   :  { %v358_v11 = vsel %vm294_vm4, %v207_v8, %v326_v9  ;;  %v366_v42 = vsel %vm302_vm9, %v217_v32, %v334_v36  ;;  %v340_v8 = vmul.f32 0.01, %v225_v4 }
  0xbf   :  { %v386_v12 = vpack.c.bf16 %v358_v11, %v356_v10  ;;  %v390_v46 = vpack.c.bf16 %v366_v42, %v364_v43 }
  0xc0   :  { %v226_v61 = vpop.f32.mrf.mxu2 }
  0xc1   :  { %v248_v13 = vpop.f32.mrf.mxu1  ;;  %545 = vmatmul.bf16.gmra.mxu2 %v386_v12  ;;  %v227_v5 = vadd.f32 %v226_v61, %v1285_v53 }
  0xc2   :  { %v249_v17 = vadd.f32 %v248_v13, %v1293_v14  ;;  %v372_v13 = vsel %vm308_vm1, %v225_v4, %v340_v8 }
  0xc3   :  { %v342_v9 = vmul.f32 0.01, %v227_v5  ;;  %vm310_vm2 = vcmp.gt.f32.partialorder %v227_v5, 0.0 }
  0xc4   :  { %v321_v21 = vmul.f32 0.01, %v249_v17  ;;  %vm289_vm6 = vcmp.gt.f32.partialorder %v249_v17, 0.0 }
  0xc5   :  { %v374_v15 = vsel %vm310_vm2, %v227_v5, %v342_v9  ;;  %v1039_v9 = vld [vmem:[#allocation8 + $0x10] sm:$0xff] }
  0xc6   :  { %v353_v27 = vsel %vm289_vm6, %v249_v17, %v321_v21  ;;  %v394_v17 = vpack.c.bf16 %v374_v15, %v372_v13  ;;  %v1038_v15 = vld [vmem:[#allocation8 + $0x8] sm:$0xff] }
  0xc8   :  { %v229_v6 = vpop.f32.mrf.mxu2 }
  0xc9   :  { %v250_v19 = vpop.f32.mrf.mxu1 }
  0xca   :  { %v251_v22 = vadd.f32 %v250_v19, %v1293_v14 }
  0xcc   :  { %vm291_vm8 = vcmp.gt.f32.partialorder %v251_v22, 0.0  ;;  %v323_v23 = vmul.f32 0.01, %v251_v22 }
  0xce   :  { %v355_v28 = vsel %vm291_vm8, %v251_v22, %v323_v23  ;;  %v230_v23 = vadd.f32 %v229_v6, %v1285_v53 }
  0xcf   :  { %v385_v30 = vpack.c.bf16 %v355_v28, %v353_v27 }
  0xd0   :  { %v231_v21 = vpop.f32.mrf.mxu2  ;;  %v344_v27 = vmul.f32 0.01, %v230_v23  ;;  %vm312_vm5 = vcmp.gt.f32.partialorder %v230_v23, 0.0 }
  0xd1   :  { %v253_v31 = vpop.f32.mrf.mxu1  ;;  %550 = vmatmul.bf16.gmra.mxu2 %v388_v29  ;;  %589 = vmatmul.bf16.vlgmr.msrb.gmra.mxu3 %v385_v30  ;;  %v232_v24 = vadd.f32 %v231_v21, %v1285_v53 }
  0xd2   :  { %v254_v34 = vadd.f32 %v253_v31, %v1293_v14  ;;  %v376_v32 = vsel %vm312_vm5, %v230_v23, %v344_v27  ;;  %v1326_v23 = vld [vmem:[%s1399_s4] ss:$0 sm:$0xff] }
  0xd3   :  { %v346_v28 = vmul.f32 0.01, %v232_v24  ;;  %vm314_vm6 = vcmp.gt.f32.partialorder %v232_v24, 0.0 }
  0xd4   :  { %v325_v39 = vmul.f32 0.01, %v254_v34  ;;  %vm293_vm11 = vcmp.gt.f32.partialorder %v254_v34, 0.0 }
  0xd5   :  { %v378_v33 = vsel %vm314_vm6, %v232_v24, %v346_v28 }
  0xd6   :  { %v357_v44 = vsel %vm293_vm11, %v254_v34, %v325_v39  ;;  %v396_v35 = vpack.c.bf16 %v378_v33, %v376_v32  ;;  %v236_v39 = vpop.f32.mrf.mxu3 }
  0xd7   :  { %v237_v42 = vadd.f32 %v236_v39, %v1285_v53 }
  0xd9   :  { %v255_v37 = vpop.f32.mrf.mxu1  ;;  %vm318_vm10 = vcmp.gt.f32.partialorder %v237_v42, 0.0 }
  0xda   :  { %v256_v40 = vadd.f32 %v255_v37, %v1293_v14 }
  0xdc   :  { %v327_v41 = vmul.f32 0.01, %v256_v40  ;;  %vm295_vm12 = vcmp.gt.f32.partialorder %v256_v40, 0.0 }
  0xde   :  { %v359_v45 = vsel %vm295_vm12, %v256_v40, %v327_v41  ;;  %v235_v41 = vadd.f32 %v234_v25, %v1285_v53 }
  0xdf   :  { %v387_v47 = vpack.c.bf16 %v359_v45, %v357_v44  ;;  %v350_v45 = vmul.f32 0.01, %v237_v42 }
  0xe0   :  { %v348_v44 = vmul.f32 0.01, %v235_v41  ;;  %vm316_vm9 = vcmp.gt.f32.partialorder %v235_v41, 0.0 }
  0xe1   :  { %v258_v48 = vpop.f32.mrf.mxu1  ;;  %555 = vmatmul.bf16.gmra.mxu2 %v390_v46  ;;  %594 = vmatmul.bf16.gmra.mxu3 %v387_v47  ;;  %v382_v50 = vsel %vm318_vm10, %v237_v42, %v350_v45 }
  0xe2   :  { %v259_v52 = vadd.f32 %v258_v48, %v1293_v14  ;;  %v380_v49 = vsel %vm316_vm9, %v235_v41, %v348_v44 }
  0xe4   :  { %v329_v57 = vmul.f32 0.01, %v259_v52  ;;  %vm297_vm15 = vcmp.gt.f32.partialorder %v259_v52, 0.0 }
  0xe6   :  { %v361_v0 = vsel %vm297_vm15, %v259_v52, %v329_v57  ;;  %v398_v52 = vpack.c.bf16 %v382_v50, %v380_v49  ;;  %v1044_v57 = vld [vmem:[#allocation8 + $0x38] sm:$0xff] }
  0xe7   :  { %754 = vmatpush.bf16.msrb.mxu0 %v1044_v57 }
  0xe9   :  { %v260_v56 = vpop.f32.mrf.mxu1 }
  0xea   :  { %v261_v58 = vadd.f32 %v260_v56, %v1293_v14 }
  0xeb   :  { %755 = vmatpush.bf16.msrb.mxu0 %v1043_v59 }
  0xec   :  { %v331_v62 = vmul.f32 0.01, %v261_v58  ;;  %vm299_vm0 = vcmp.gt.f32.partialorder %v261_v58, 0.0 }
  0xee   :  { %v363_v1 = vsel %vm299_vm0, %v261_v58, %v331_v62 }
  0xef   :  { %v389_v2 = vpack.c.bf16 %v363_v1, %v361_v0  ;;  %v1042_v0 = vld [vmem:[#allocation8 + $0x28] sm:$0xff] }
  0xf0   :  { %756 = vmatpush.bf16.msrb.mxu0 %v1042_v0 }
  0xf1   :  { %v263_v3 = vpop.f32.mrf.mxu1  ;;  %599 = vmatmul.bf16.gmra.mxu3 %v389_v2  ;;  %560 = vmatmul.bf16.gmra.mxu2 %v392_v63 }
  0xf2   :  { %v264_v7 = vadd.f32 %v263_v3, %v1293_v14  ;;  %v1041_v3 = vld [vmem:[#allocation8 + $0x20] sm:$0xff] }
  0xf4   :  { %v333_v11 = vmul.f32 0.01, %v264_v7  ;;  %vm301_vm3 = vcmp.gt.f32.partialorder %v264_v7, 0.0  ;;  %757 = vmatpush.bf16.msrb.mxu0 %v1041_v3 }
  0xf6   :  { %v365_v18 = vsel %vm301_vm3, %v264_v7, %v333_v11  ;;  %v1040_v7 = vld [vmem:[#allocation8 + $0x18] sm:$0xff] }
  0xf8   :  { %758 = vmatpush.bf16.msrb.mxu0 %v1040_v7 }
  0xf9   :  { %v265_v10 = vpop.f32.mrf.mxu1 }
  0xfa   :  { %v266_v12 = vadd.f32 %v265_v10, %v1293_v14 }
  0xfc   :  { %v335_v16 = vmul.f32 0.01, %v266_v12  ;;  %vm303_vm4 = vcmp.gt.f32.partialorder %v266_v12, 0.0  ;;  %759 = vmatpush.bf16.msrb.mxu0 %v1039_v9 }
  0xfe   :  { %v367_v19 = vsel %vm303_vm4, %v266_v12, %v335_v16 }
  0xff   :  { %v391_v20 = vpack.c.bf16 %v367_v19, %v365_v18 }
 0x100   :  { %760 = vmatpush.bf16.msrb.mxu0 %v1038_v15 }
 0x101   :  { %v268_v22 = vpop.f32.mrf.mxu1  ;;  %604 = vmatmul.bf16.gmra.mxu3 %v391_v20  ;;  %565 = vmatmul.bf16.gmra.mxu2 %v394_v17  ;;  %v1037_v20 = vld [vmem:[#allocation8] sm:$0xff] }
 0x102   :  { %v269_v26 = vadd.f32 %v268_v22, %v1293_v14 }
 0x104   :  { %v337_v30 = vmul.f32 0.01, %v269_v26  ;;  %vm305_vm7 = vcmp.gt.f32.partialorder %v269_v26, 0.0  ;;  %761 = vmatpush.bf16.msrb.mxu0 %v1037_v20 }
 0x106   :  { %v369_v36 = vsel %vm305_vm7, %v269_v26, %v337_v30 }
 0x109   :  { %v270_v29 = vpop.f32.mrf.mxu1 }
 0x10a   :  { %v271_v31 = vadd.f32 %v270_v29, %v1293_v14 }
 0x10c   :  { %v339_v34 = vmul.f32 0.01, %v271_v31  ;;  %vm307_vm8 = vcmp.gt.f32.partialorder %v271_v31, 0.0 }
 0x10e   :  { %v371_v37 = vsel %vm307_vm8, %v271_v31, %v339_v34 }
 0x10f   :  { %v393_v38 = vpack.c.bf16 %v371_v37, %v369_v36 }
 0x111   :  { %v273_v40 = vpop.f32.mrf.mxu1  ;;  %609 = vmatmul.bf16.gmra.mxu3 %v393_v38  ;;  %570 = vmatmul.bf16.gmra.mxu2 %v396_v35 }
 0x112   :  { %v274_v43 = vadd.f32 %v273_v40, %v1293_v14 }
 0x114   :  { %v341_v47 = vmul.f32 0.01, %v274_v43  ;;  %vm309_vm11 = vcmp.gt.f32.partialorder %v274_v43, 0.0 }
 0x116   :  { %v373_v54 = vsel %vm309_vm11, %v274_v43, %v341_v47 }
 0x119   :  { %v275_v46 = vpop.f32.mrf.mxu1 }
 0x11a   :  { %v276_v48 = vadd.f32 %v275_v46, %v1293_v14 }
 0x11c   :  { %v343_v51 = vmul.f32 0.01, %v276_v48  ;;  %vm311_vm12 = vcmp.gt.f32.partialorder %v276_v48, 0.0 }
 0x11e   :  { %v375_v55 = vsel %vm311_vm12, %v276_v48, %v343_v51 }
 0x11f   :  { %v395_v56 = vpack.c.bf16 %v375_v55, %v373_v54 }
 0x121   :  { %v278_v53 = vpop.f32.mrf.mxu1  ;;  %614 = vmatmul.bf16.gmra.mxu3 %v395_v56  ;;  %575 = vmatmul.bf16.gmra.mxu2 %v398_v52 }
 0x122   :  { %v279_v58 = vadd.f32 %v278_v53, %v1293_v14 }
 0x124   :  { %v345_v61 = vmul.f32 0.01, %v279_v58  ;;  %vm313_vm13 = vcmp.gt.f32.partialorder %v279_v58, 0.0 }
 0x126   :  { %v377_v1 = vsel %vm313_vm13, %v279_v58, %v345_v61 }
 0x129   :  { %v280_v60 = vpop.f32.mrf.mxu1 }
 0x12a   :  { %v281_v62 = vadd.f32 %v280_v60, %v1293_v14 }
 0x12c   :  { %v347_v63 = vmul.f32 0.01, %v281_v62  ;;  %vm315_vm14 = vcmp.gt.f32.partialorder %v281_v62, 0.0 }
 0x12e   :  { %v379_v2 = vsel %vm315_vm14, %v281_v62, %v347_v63 }
 0x12f   :  { %v397_v4 = vpack.c.bf16 %v379_v2, %v377_v1 }
 0x131   :  { %v283_v5 = vpop.f32.mrf.mxu1  ;;  %619 = vmatmul.bf16.gmra.mxu3 %v397_v4 }
 0x132   :  { %v284_v8 = vadd.f32 %v283_v5, %v1293_v14 }
 0x134   :  { %v541_v6 = vpop.f32.mrf.mxu2  ;;  %v349_v11 = vmul.f32 0.01, %v284_v8  ;;  %vm317_vm15 = vcmp.gt.f32.partialorder %v284_v8, 0.0 }
 0x135   :  { %v542_v24 = vadd.f32 %v1326_v23, %v541_v6 }
 0x136   :  { %v381_v17 = vsel %vm317_vm15, %v284_v8, %v349_v11 }
 0x139   :  { %v285_v10 = vpop.f32.mrf.mxu1 }
 0x13a   :  { %v286_v12 = vadd.f32 %v285_v10, %v1293_v14 }
 0x13c   :  { %v351_v13 = vmul.f32 0.01, %v286_v12  ;;  %vm319_vm0 = vcmp.gt.f32.partialorder %v286_v12, 0.0  ;;  %v543_v16 = vpop.f32.mrf.mxu2 }
 0x13d   :  { %v544_v26 = vadd.f32 %v1326_v23, %v543_v16 }
 0x13e   :  { %v383_v18 = vsel %vm319_vm0, %v286_v12, %v351_v13 }
 0x13f   :  { %v399_v19 = vpack.c.bf16 %v383_v18, %v381_v17 }
 0x141   :  { %624 = vmatmul.bf16.gmra.mxu3 %v399_v19 }
 0x144   :  { %v546_v21 = vpop.f32.mrf.mxu2 }
 0x145   :  { %v547_v37 = vadd.f32 %v1326_v23, %v546_v21 }
 0x14c   :  { %v548_v22 = vpop.f32.mrf.mxu2 }
 0x14d   :  { %v549_v39 = vadd.f32 %v1326_v23, %v548_v22 }
 0x154   :  { %v590_v14 = vpop.f32.mrf.mxu3  ;;  %v551_v27 = vpop.f32.mrf.mxu2 }
 0x155   :  { %v591_v25 = vadd.f32 %v590_v14, %v542_v24  ;;  %v552_v49 = vadd.f32 %v1326_v23, %v551_v27 }
 0x157   :  { %v646_v29 = vmul.f32 0.01, %v591_v25  ;;  %vm630_vm1 = vcmp.gt.f32.partialorder %v591_v25, 0.0 }
 0x159   :  { %v662_v32 = vsel %vm630_vm1, %v591_v25, %v646_v29 }
 0x15c   :  { %v592_v28 = vpop.f32.mrf.mxu3  ;;  %v553_v36 = vpop.f32.mrf.mxu2 }
 0x15d   :  { %v593_v30 = vadd.f32 %v592_v28, %v544_v26  ;;  %v554_v52 = vadd.f32 %v1326_v23, %v553_v36 }
 0x15f   :  { %vm631_vm2 = vcmp.gt.f32.partialorder %v593_v30, 0.0  ;;  %v647_v31 = vmul.f32 0.01, %v593_v30 }
 0x161   :  { %v663_v33 = vsel %vm631_vm2, %v593_v30, %v647_v31 }
 0x162   :  { %v678_v34 = vpack.c.bf16 %v663_v33, %v662_v32 }
 0x164   :  { %v595_v35 = vpop.f32.mrf.mxu3  ;;  %762 = vmatmul.bf16.vlgmr.msrb.gmra.mxu0 %v678_v34  ;;  %v556_v44 = vpop.f32.mrf.mxu2 }
 0x165   :  { %v596_v38 = vadd.f32 %v595_v35, %v547_v37  ;;  %v557_v62 = vadd.f32 %v1326_v23, %v556_v44 }
 0x167   :  { %v648_v41 = vmul.f32 0.01, %v596_v38  ;;  %vm632_vm3 = vcmp.gt.f32.partialorder %v596_v38, 0.0 }
 0x169   :  { %v664_v45 = vsel %vm632_vm3, %v596_v38, %v648_v41 }
 0x16c   :  { %v597_v40 = vpop.f32.mrf.mxu3  ;;  %v558_v51 = vpop.f32.mrf.mxu2 }
 0x16d   :  { %v598_v42 = vadd.f32 %v597_v40, %v549_v39  ;;  %v559_v0 = vadd.f32 %v1326_v23, %v558_v51 }
 0x16f   :  { %v649_v43 = vmul.f32 0.01, %v598_v42  ;;  %vm633_vm4 = vcmp.gt.f32.partialorder %v598_v42, 0.0 }
 0x171   :  { %v665_v46 = vsel %vm633_vm4, %v598_v42, %v649_v43 }
 0x172   :  { %v679_v47 = vpack.c.bf16 %v665_v46, %v664_v45 }
 0x174   :  { %v600_v48 = vpop.f32.mrf.mxu3  ;;  %767 = vmatmul.bf16.gmra.mxu0 %v679_v47  ;;  %v561_v59 = vpop.f32.mrf.mxu2 }
 0x175   :  { %v601_v50 = vadd.f32 %v600_v48, %v552_v49  ;;  %v562_v11 = vadd.f32 %v1326_v23, %v561_v59 }
 0x177   :  { %v650_v55 = vmul.f32 0.01, %v601_v50  ;;  %vm634_vm5 = vcmp.gt.f32.partialorder %v601_v50, 0.0 }
 0x179   :  { %v666_v57 = vsel %vm634_vm5, %v601_v50, %v650_v55 }
 0x17c   :  { %v602_v54 = vpop.f32.mrf.mxu3  ;;  %v563_v1 = vpop.f32.mrf.mxu2 }
 0x17d   :  { %v603_v56 = vadd.f32 %v602_v54, %v554_v52  ;;  %v564_v13 = vadd.f32 %v1326_v23, %v563_v1 }
 0x17f   :  { %v651_v53 = vmul.f32 0.01, %v603_v56  ;;  %vm635_vm6 = vcmp.gt.f32.partialorder %v603_v56, 0.0 }
 0x181   :  { %v667_v58 = vsel %vm635_vm6, %v603_v56, %v651_v53 }
 0x182   :  { %v680_v60 = vpack.c.bf16 %v667_v58, %v666_v57 }
 0x184   :  { %v605_v61 = vpop.f32.mrf.mxu3  ;;  %772 = vmatmul.bf16.gmra.mxu0 %v680_v60  ;;  %v566_v10 = vpop.f32.mrf.mxu2 }
 0x185   :  { %v606_v63 = vadd.f32 %v605_v61, %v557_v62  ;;  %v567_v24 = vadd.f32 %v1326_v23, %v566_v10  ;;  %v1344_v61 = vld [vmem:[#allocation10] ss:$0 sm:$0xff] }
 0x187   :  { %v652_v3 = vmul.f32 0.01, %v606_v63  ;;  %vm636_vm7 = vcmp.gt.f32.partialorder %v606_v63, 0.0 }
 0x189   :  { %v668_v6 = vsel %vm636_vm7, %v606_v63, %v652_v3 }
 0x18c   :  { %v607_v2 = vpop.f32.mrf.mxu3  ;;  %v568_v19 = vpop.f32.mrf.mxu2 }
 0x18d   :  { %v608_v4 = vadd.f32 %v607_v2, %v559_v0  ;;  %v569_v27 = vadd.f32 %v1326_v23, %v568_v19 }
 0x18f   :  { %v653_v5 = vmul.f32 0.01, %v608_v4  ;;  %vm637_vm8 = vcmp.gt.f32.partialorder %v608_v4, 0.0 }
 0x191   :  { %v669_v7 = vsel %vm637_vm8, %v608_v4, %v653_v5 }
 0x192   :  { %v681_v8 = vpack.c.bf16 %v669_v7, %v668_v6 }
 0x194   :  { %v610_v9 = vpop.f32.mrf.mxu3  ;;  %777 = vmatmul.bf16.gmra.mxu0 %v681_v8  ;;  %v571_v26 = vpop.f32.mrf.mxu2 }
 0x195   :  { %v611_v12 = vadd.f32 %v610_v9, %v562_v11  ;;  %v572_v37 = vadd.f32 %v1326_v23, %v571_v26 }
 0x197   :  { %v654_v16 = vmul.f32 0.01, %v611_v12  ;;  %vm638_vm9 = vcmp.gt.f32.partialorder %v611_v12, 0.0 }
 0x199   :  { %v670_v20 = vsel %vm638_vm9, %v611_v12, %v654_v16 }
 0x19c   :  { %v612_v15 = vpop.f32.mrf.mxu3  ;;  %v573_v35 = vpop.f32.mrf.mxu2 }
 0x19d   :  { %v613_v17 = vadd.f32 %v612_v15, %v564_v13  ;;  %v574_v39 = vadd.f32 %v1326_v23, %v573_v35 }
 0x19f   :  { %v655_v18 = vmul.f32 0.01, %v613_v17  ;;  %vm639_vm10 = vcmp.gt.f32.partialorder %v613_v17, 0.0 }
 0x1a1   :  { %v671_v21 = vsel %vm639_vm10, %v613_v17, %v655_v18 }
 0x1a2   :  { %v682_v22 = vpack.c.bf16 %v671_v21, %v670_v20 }
 0x1a4   :  { %v615_v14 = vpop.f32.mrf.mxu3  ;;  %782 = vmatmul.bf16.gmra.mxu0 %v682_v22  ;;  %v576_v43 = vpop.f32.mrf.mxu2 }
 0x1a5   :  { %v616_v25 = vadd.f32 %v615_v14, %v567_v24  ;;  %v577_v49 = vadd.f32 %v1326_v23, %v576_v43 }
 0x1a7   :  { %v656_v29 = vmul.f32 0.01, %v616_v25  ;;  %vm640_vm11 = vcmp.gt.f32.partialorder %v616_v25, 0.0 }
 0x1a9   :  { %v672_v32 = vsel %vm640_vm11, %v616_v25, %v656_v29 }
 0x1ac   :  { %v617_v28 = vpop.f32.mrf.mxu3  ;;  %v578_v50 = vpop.f32.mrf.mxu2 }
 0x1ad   :  { %v618_v30 = vadd.f32 %v617_v28, %v569_v27  ;;  %v579_v52 = vadd.f32 %v1326_v23, %v578_v50 }
 0x1af   :  { %v657_v31 = vmul.f32 0.01, %v618_v30  ;;  %vm641_vm12 = vcmp.gt.f32.partialorder %v618_v30, 0.0 }
 0x1b1   :  { %v673_v33 = vsel %vm641_vm12, %v618_v30, %v657_v31 }
 0x1b2   :  { %v683_v34 = vpack.c.bf16 %v673_v33, %v672_v32 }
 0x1b4   :  { %v620_v36 = vpop.f32.mrf.mxu3  ;;  %787 = vmatmul.bf16.gmra.mxu0 %v683_v34 }
 0x1b5   :  { %v621_v38 = vadd.f32 %v620_v36, %v572_v37 }
 0x1b7   :  { %v658_v41 = vmul.f32 0.01, %v621_v38  ;;  %vm642_vm13 = vcmp.gt.f32.partialorder %v621_v38, 0.0 }
 0x1b9   :  { %v674_v45 = vsel %vm642_vm13, %v621_v38, %v658_v41 }
 0x1bc   :  { %v622_v40 = vpop.f32.mrf.mxu3 }
 0x1bd   :  { %v623_v42 = vadd.f32 %v622_v40, %v574_v39 }
 0x1bf   :  { %v659_v44 = vmul.f32 0.01, %v623_v42  ;;  %vm643_vm14 = vcmp.gt.f32.partialorder %v623_v42, 0.0 }
 0x1c1   :  { %v675_v46 = vsel %vm643_vm14, %v623_v42, %v659_v44 }
 0x1c2   :  { %v684_v47 = vpack.c.bf16 %v675_v46, %v674_v45 }
 0x1c4   :  { %v625_v48 = vpop.f32.mrf.mxu3  ;;  %792 = vmatmul.bf16.gmra.mxu0 %v684_v47 }
 0x1c5   :  { %v626_v51 = vadd.f32 %v625_v48, %v577_v49 }
 0x1c7   :  { %v660_v55 = vmul.f32 0.01, %v626_v51  ;;  %vm644_vm15 = vcmp.gt.f32.partialorder %v626_v51, 0.0 }
 0x1c9   :  { %v676_v57 = vsel %vm644_vm15, %v626_v51, %v660_v55 }
 0x1cc   :  { %v627_v54 = vpop.f32.mrf.mxu3 }
 0x1cd   :  { %v628_v56 = vadd.f32 %v627_v54, %v579_v52 }
 0x1cf   :  { %v661_v53 = vmul.f32 0.01, %v628_v56  ;;  %vm645_vm0 = vcmp.gt.f32.partialorder %v628_v56, 0.0 }
 0x1d1   :  { %v677_v58 = vsel %vm645_vm0, %v628_v56, %v661_v53 }
 0x1d2   :  { %v685_v59 = vpack.c.bf16 %v677_v58, %v676_v57 }
 0x1d4   :  { %797 = vmatmul.bf16.gmra.mxu0 %v685_v59 }
 0x1e1   :  { %v763_v60 = vpop.f32.mrf.mxu0 }
 0x1e2   :  { %v764_v62 = vadd.f32 %v1344_v61, %v763_v60 }
 0x1e4   :  { %v819_v0 = vmul.f32 0.01, %v764_v62  ;;  %vm803_vm1 = vcmp.gt.f32.partialorder %v764_v62, 0.0 }
 0x1e6   :  { %v1348_v2 = vsel %vm803_vm1, %v764_v62, %v819_v0 }
 0x1e9   :  { %v765_v63 = vpop.f32.mrf.mxu0 }
 0x1ea   :  { %v766_v1 = vadd.f32 %v1344_v61, %v765_v63 }
 0x1ec   :  { %vm804_vm2 = vcmp.gt.f32.partialorder %v766_v1, 0.0  ;;  %v820_v23 = vmul.f32 0.01, %v766_v1 }
 0x1ee   :  { %v1350_v3 = vsel %vm804_vm2, %v766_v1, %v820_v23 }
 0x1ef   :  { %v851_v4 = vpack.c.bf16 %v1350_v3, %v1348_v2 }
 0x1f1   :  { %v768_v5 = vpop.f32.mrf.mxu0 }
 0x1f2   :  { %v769_v6 = vadd.f32 %v1344_v61, %v768_v5 }
 0x1f4   :  { %v821_v8 = vmul.f32 0.01, %v769_v6  ;;  %vm805_vm3 = vcmp.gt.f32.partialorder %v769_v6, 0.0 }
 0x1f6   :  { %v1356_v11 = vsel %vm805_vm3, %v769_v6, %v821_v8  ;;  %v873_v8 = vld [vmem:[#allocation2] sm:$0x1] }
 0x1f9   :  { %v770_v7 = vpop.f32.mrf.mxu0 }
 0x1fa   :  { %v771_v9 = vadd.f32 %v1344_v61, %v770_v7 }
 0x1fc   :  { %vm806_vm4 = vcmp.gt.f32.partialorder %v771_v9, 0.0  ;;  %v822_v10 = vmul.f32 0.01, %v771_v9 }
 0x1fe   :  { %v1358_v12 = vsel %vm806_vm4, %v771_v9, %v822_v10  ;;  %v1199_v9 = vmov 0  }
 0x1ff   :  { %v852_v13 = vpack.c.bf16 %v1358_v12, %v1356_v11  ;;  %1061 = vset.pattern.permute.xlu0 %v1199_v9 }
 0x200   :  { %876 = vperm.xlu0 %1061, %v873_v8  }
 0x201   :  { %v773_v15 = vpop.f32.mrf.mxu0 }
 0x202   :  { %v774_v16 = vadd.f32 %v1344_v61, %v773_v15 }
 0x204   :  { %v823_v18 = vmul.f32 0.01, %v774_v16  ;;  %vm807_vm5 = vcmp.gt.f32.partialorder %v774_v16, 0.0 }
 0x206   :  { %v1364_v21 = vsel %vm807_vm5, %v774_v16, %v823_v18 }
 0x209   :  { %v775_v17 = vpop.f32.mrf.mxu0 }
 0x20a   :  { %v776_v19 = vadd.f32 %v1344_v61, %v775_v17 }
 0x20c   :  { %vm808_vm6 = vcmp.gt.f32.partialorder %v776_v19, 0.0  ;;  %v824_v20 = vmul.f32 0.01, %v776_v19 }
 0x20e   :  { %v1366_v22 = vsel %vm808_vm6, %v776_v19, %v824_v20 }
 0x20f   :  { %v853_v14 = vpack.c.bf16 %v1366_v22, %v1364_v21 }
 0x211   :  { %v778_v24 = vpop.f32.mrf.mxu0 }
 0x212   :  { %v779_v25 = vadd.f32 %v1344_v61, %v778_v24 }
 0x214   :  { %v825_v27 = vmul.f32 0.01, %v779_v25  ;;  %vm809_vm7 = vcmp.gt.f32.partialorder %v779_v25, 0.0 }
 0x216   :  { %v841_v30 = vsel %vm809_vm7, %v779_v25, %v825_v27 }
 0x219   :  { %v780_v26 = vpop.f32.mrf.mxu0 }
 0x21a   :  { %v781_v28 = vadd.f32 %v1344_v61, %v780_v26 }
 0x21c   :  { %vm810_vm8 = vcmp.gt.f32.partialorder %v781_v28, 0.0  ;;  %v826_v29 = vmul.f32 0.01, %v781_v28 }
 0x21e   :  { %v842_v31 = vsel %vm810_vm8, %v781_v28, %v826_v29 }
 0x21f   :  { %v854_v32 = vpack.c.bf16 %v842_v31, %v841_v30 }
 0x221   :  { %v783_v33 = vpop.f32.mrf.mxu0 }
 0x222   :  { %v784_v34 = vadd.f32 %v1344_v61, %v783_v33 }
 0x224   :  { %v827_v36 = vmul.f32 0.01, %v784_v34  ;;  %vm811_vm9 = vcmp.gt.f32.partialorder %v784_v34, 0.0 }
 0x226   :  { %v843_v39 = vsel %vm811_vm9, %v784_v34, %v827_v36 }
 0x229   :  { %v785_v35 = vpop.f32.mrf.mxu0 }
 0x22a   :  { %v786_v37 = vadd.f32 %v1344_v61, %v785_v35 }
 0x22c   :  { %vm812_vm10 = vcmp.gt.f32.partialorder %v786_v37, 0.0  ;;  %v828_v38 = vmul.f32 0.01, %v786_v37 }
 0x22e   :  { %v844_v40 = vsel %vm812_vm10, %v786_v37, %v828_v38 }
 0x22f   :  { %v855_v41 = vpack.c.bf16 %v844_v40, %v843_v39 }
 0x231   :  { %v788_v42 = vpop.f32.mrf.mxu0 }
 0x232   :  { %v789_v62 = vadd.f32 %v1344_v61, %v788_v42 }
 0x234   :  { %v829_v23 = vmul.f32 0.01, %v789_v62  ;;  %vm813_vm0 = vcmp.gt.f32.partialorder %v789_v62, 0.0 }
 0x236   :  { %v845_v6 = vsel %vm813_vm0, %v789_v62, %v829_v23 }
 0x239   :  { %v790_v43 = vpop.f32.mrf.mxu0 }
 0x23a   :  { %v791_v59 = vadd.f32 %v1344_v61, %v790_v43 }
 0x23c   :  { %v830_v1 = vmul.f32 0.01, %v791_v59  ;;  %vm814_vm15 = vcmp.gt.f32.partialorder %v791_v59, 0.0 }
 0x23e   :  { %v846_v5 = vsel %vm814_vm15, %v791_v59, %v830_v1 }
 0x23f   :  { %v856_v7 = vpack.c.bf16 %v846_v5, %v845_v6 }
 0x241   :  { %v793_v44 = vpop.f32.mrf.mxu0 }
 0x242   :  { %v794_v54 = vadd.f32 %v1344_v61, %v793_v44 }
 0x244   :  { %v831_v58 = vmul.f32 0.01, %v794_v54  ;;  %vm815_vm14 = vcmp.gt.f32.partialorder %v794_v54, 0.0 }
 0x246   :  { %v847_v63 = vsel %vm815_vm14, %v794_v54, %v831_v58 }
 0x249   :  { %v795_v45 = vpop.f32.mrf.mxu0 }
 0x24a   :  { %v796_v51 = vadd.f32 %v1344_v61, %v795_v45 }
 0x24c   :  { %v832_v57 = vmul.f32 0.01, %v796_v51  ;;  %vm816_vm13 = vcmp.gt.f32.partialorder %v796_v51, 0.0 }
 0x24e   :  { %v848_v60 = vsel %vm816_vm13, %v796_v51, %v832_v57 }
 0x24f   :  { %v857_v0 = vpack.c.bf16 %v848_v60, %v847_v63 }
 0x251   :  { %v798_v46 = vpop.f32.mrf.mxu0 }
 0x252   :  { %v799_v47 = vadd.f32 %v1344_v61, %v798_v46 }
 0x254   :  { %v833_v49 = vmul.f32 0.01, %v799_v47  ;;  %vm817_vm11 = vcmp.gt.f32.partialorder %v799_v47, 0.0 }
 0x256   :  { %v849_v55 = vsel %vm817_vm11, %v799_v47, %v833_v49 }
 0x259   :  { %v800_v48 = vpop.f32.mrf.mxu0 }
 0x25a   :  { %v801_v50 = vadd.f32 %v1344_v61, %v800_v48  ;;  %v859_v61 = vld [vmem:[%s1402_s7] sm:$0xf] }
 0x25c   :  { %vm818_vm12 = vcmp.gt.f32.partialorder %v801_v50, 0.0  ;;  %v834_v52 = vmul.f32 0.01, %v801_v50 }
 0x25e   :  { %v850_v56 = vsel %vm818_vm12, %v801_v50, %v834_v52 }
 0x25f   :  { %v858_v53 = vpack.c.bf16 %v850_v56, %v849_v55 }
 0x261   :  { %860 = vmatpush.bf16.xpose.msra.mxu1 %v858_v53 }
 0x269   :  { %861 = vmatpush.bf16.xpose.msra.mxu1 %v857_v0 }
 0x271   :  { %862 = vmatpush.bf16.xpose.msra.mxu1 %v856_v7 }
 0x272   :  { %v877_v10 = vpop.permute.xlu0 %876 }
 0x273   :  { %v879_v15 = vperm.slane %v877_v10, 0 }
 0x279   :  { %863 = vmatpush.bf16.xpose.msra.mxu1 %v855_v41 }
 0x281   :  { %864 = vmatpush.bf16.xpose.msra.mxu1 %v854_v32 }
 0x289   :  { %865 = vmatpush.bf16.xpose.msra.mxu1 %v853_v14 }
 0x291   :  { %866 = vmatpush.bf16.xpose.msra.mxu1 %v852_v13 }
 0x299   :  { %867 = vmatpush.bf16.xpose.msra.mxu1 %v851_v4 }
 0x2a0   :  { %868 = vmatmul.bf16.vlgmr.msra.gmra.mxu1 %v859_v61 }
 0x31d   :  { %v869_v16 = vpop.f32.mrf.mxu1 }
 0x31e   :  { %v880_v17 = vadd.f32 %v879_v15, %v869_v16 }
 0x320   :  { %881 = vst [vmem:[%s1404_s9] sm:$0x1] %v880_v17 }
 0x325   :  { %v871_v18 = vpop.f32.mrf.mxu1 }
 0x326   :  { %886 = vsyncpa [#allocation4], 1 }
 0x327   :  { %887 = vsyncpa [#allocation6], 1 }
 0x328   :  { %888 = vsyncpa [#allocation9], 1 }

</bundles_post_ra>
